<compile_context>
chip_gen: v6e
topology: v6e:2x2x1
jax: 0.10.0
libtpu: 0.0.40
codegen_flags: <defaults>
</compile_context>

<pallas_src>
import functools

import jax
import jax.numpy as jnp
from jax.experimental import pallas as pl
from jax.experimental.pallas import tpu as pltpu

IN_FEATURES = 28 * 28  # 784
_LANE = 128


def _round_up(x, m):
    return (x + m - 1) // m * m


def _decoder_kernel(z_ref, w1_ref, b1_ref, w2_ref, b2_ref, out_ref, *, out_cols):
    # hidden = tanh(z @ W1 + b1): bf16 operands on the MXU, f32 accumulation,
    # bias add + tanh in f32 (VPU/EUP-native path).
    h = jnp.tanh(
        jnp.dot(
            z_ref[...].astype(jnp.bfloat16),
            w1_ref[...],
            preferred_element_type=jnp.float32,
        )
        + b1_ref[...]
    )
    # mean = sigmoid(h @ W2 + b2): only the matmul operands are bf16.
    logits = (
        jnp.dot(
            h.astype(jnp.bfloat16),
            w2_ref[...],
            preferred_element_type=jnp.float32,
        )
        + b2_ref[...]
    )
    # Keep only the real output columns: the HBM store stream is exactly the
    # logical output (no wrapper-side slice/copy), and padded columns skip the
    # sigmoid entirely.
    out_ref[...] = jax.nn.sigmoid(logits[:, :out_cols]).astype(out_ref.dtype)


def prepare_decoder_params(w1, b1, w2, b2):
    """One-time preprocessing: pad H/O to lane multiples (128) and cast the
    matmul weights to bf16.  Zero padding is exact (tanh(0)=0 multiplies zero
    W2 rows).  Call once; reuse the result across forward calls."""
    z_dim, H = w1.shape
    O = w2.shape[1]
    H_pad = _round_up(H, _LANE)
    O_pad = _round_up(O, _LANE)
    w1_p = jnp.zeros((z_dim, H_pad), jnp.bfloat16).at[:, :H].set(w1.astype(jnp.bfloat16))
    b1_p = jnp.zeros((1, H_pad), jnp.float32).at[:, :H].set(b1.astype(jnp.float32))
    w2_p = jnp.zeros((H_pad, O_pad), jnp.bfloat16).at[:H, :O].set(w2.astype(jnp.bfloat16))
    b2_p = jnp.zeros((1, O_pad), jnp.float32).at[:, :O].set(b2.astype(jnp.float32))
    return w1_p, b1_p, w2_p, b2_p


@functools.partial(jax.jit, static_argnames=("out_features", "block_m", "out_dtype"))
def decoder_forward(z, w1_p, b1_p, w2_p, b2_p, *, out_features=IN_FEATURES,
                    block_m=512, out_dtype=jnp.float32):
    """VAE decoder forward on pre-padded params (see prepare_decoder_params).

    z:    (B, z_dim) f32
    w1_p: (z_dim, H_pad) bf16
    b1_p: (1, H_pad)     f32
    w2_p: (H_pad, O_pad) bf16
    b2_p: (1, O_pad)     f32
    Returns (B, out_features) Bernoulli means in out_dtype.
    """
    B, z_dim = z.shape
    H_pad = w1_p.shape[1]
    O_pad = w2_p.shape[1]

    # Divisor-aware batch tiling: tm is a multiple of 8, waste < 8 rows/tile,
    # and >= 2 grid steps when B > 8 so both v7x TensorCores get work.
    block_m = max(8, (int(block_m) // 8) * 8)
    ntiles = pl.cdiv(_round_up(B, 8), block_m)
    if B > 8:
        ntiles = max(ntiles, 2)
    tm = _round_up(pl.cdiv(B, ntiles), 8)
    B_pad = ntiles * tm

    z_p = z if B_pad == B else jnp.zeros((B_pad, z_dim), z.dtype).at[:B].set(z)

    out_itemsize = jnp.dtype(out_dtype).itemsize
    cost = pl.CostEstimate(
        flops=2 * B_pad * (z_dim * H_pad + H_pad * O_pad),
        transcendentals=B_pad * (H_pad + out_features),
        bytes_accessed=(
            B_pad * z_dim * 4
            + B_pad * out_features * out_itemsize
            + w1_p.size * 2 + w2_p.size * 2
            + b1_p.size * 4 + b2_p.size * 4
        ),
    )

    out = pl.pallas_call(
        functools.partial(_decoder_kernel, out_cols=out_features),
        out_shape=jax.ShapeDtypeStruct((B_pad, out_features), out_dtype),
        grid=(ntiles,),
        in_specs=[
            pl.BlockSpec((tm, z_dim), lambda i: (i, 0)),      # z tile (pipelined)
            pl.BlockSpec((z_dim, H_pad), lambda i: (0, 0)),   # weights: constant
            pl.BlockSpec((1, H_pad), lambda i: (0, 0)),       # index_map -> stay
            pl.BlockSpec((H_pad, O_pad), lambda i: (0, 0)),   # VMEM-resident
            pl.BlockSpec((1, O_pad), lambda i: (0, 0)),
        ],
        out_specs=pl.BlockSpec((tm, out_features), lambda i: (i, 0)),
        compiler_params=pltpu.CompilerParams(
            dimension_semantics=("parallel",),
        ),
        cost_estimate=cost,
    )(z_p, w1_p, b1_p, w2_p, b2_p)

    return out if B_pad == B else out[:B]


def init_decoder_params(key, z_dim=20, hidden_dim=500, out_features=IN_FEATURES):
    """Deterministic synthetic parameters matching nn.Linear shapes.

    PyTorch stores linear_hidden_layer.weight as (hidden, z_dim); we keep the
    transposed (z_dim, hidden) layout so the kernel computes x @ W + b.
    """
    k1, k2, k3, k4 = jax.random.split(key, 4)
    scale1 = 1.0 / jnp.sqrt(z_dim)
    scale2 = 1.0 / jnp.sqrt(hidden_dim)
    w1 = jax.random.uniform(k1, (z_dim, hidden_dim), jnp.float32, -scale1, scale1)
    b1 = jax.random.uniform(k2, (1, hidden_dim), jnp.float32, -scale1, scale1)
    w2 = jax.random.uniform(k3, (hidden_dim, out_features), jnp.float32, -scale2, scale2)
    b2 = jax.random.uniform(k4, (1, out_features), jnp.float32, -scale2, scale2)
    return w1, b1, w2, b2


def decoder_reference(z, w1, b1, w2, b2):
    h = jnp.tanh(z @ w1 + b1)
    return jax.nn.sigmoid(h @ w2 + b2)


if __name__ == "__main__":
    key = jax.random.PRNGKey(0)
    k_z, k_p = jax.random.split(key)

    batch, z_dim, hidden_dim = 8, 20, 500
    z = jax.random.normal(k_z, (batch, z_dim), jnp.float32)
    w1, b1, w2, b2 = init_decoder_params(k_p, z_dim=z_dim, hidden_dim=hidden_dim)

    # One-time weight preprocessing (hoisted out of the per-call path).
    params = prepare_decoder_params(w1, b1, w2, b2)
    w1_p, b1_p, w2_p, b2_p = jax.block_until_ready(params)

    out = decoder_forward(z, w1_p, b1_p, w2_p, b2_p)
    out = jax.block_until_ready(out)
    assert out.shape == (batch, IN_FEATURES), out.shape

    # f32 reference; the kernel uses bf16 MXU operands with f32 accumulation,
    # which lands ~1e-3 abs error on the sigmoid outputs.
    ref = decoder_reference(z, w1, b1, w2, b2)
    assert jnp.allclose(out, ref, atol=1e-2, rtol=1e-2), "mismatch vs f32 reference"
    assert bool(jnp.all(jnp.isfinite(out))), "non-finite output"
    assert bool(jnp.all((out >= 0.0) & (out <= 1.0))), "output outside [0, 1]"

    # Exercise the ragged-batch path (batch not a multiple of 8, >1 grid step).
    z_ragged = jax.random.normal(k_z, (10, z_dim), jnp.float32)
    out_ragged = jax.block_until_ready(
        decoder_forward(z_ragged, w1_p, b1_p, w2_p, b2_p)
    )
    ref_ragged = decoder_reference(z_ragged, w1, b1, w2, b2)
    assert out_ragged.shape == (10, IN_FEATURES), out_ragged.shape
    assert jnp.allclose(out_ragged, ref_ragged, atol=1e-2, rtol=1e-2), \
        "mismatch vs f32 reference (ragged batch)"

    print("KERNEL_OK")
</pallas_src>

<mosaic_0001>
module attributes {stable_mosaic.version = 11 : i64} {
  func.func @_decoder_kernel(%arg0: i32, %arg1: memref<8x20xf32, #tpu.memory_space<vmem>>, %arg2: memref<20x512xbf16, #tpu.memory_space<vmem>>, %arg3: memref<1x512xf32, #tpu.memory_space<vmem>>, %arg4: memref<512x896xbf16, #tpu.memory_space<vmem>>, %arg5: memref<1x896xf32, #tpu.memory_space<vmem>>, %arg6: memref<8x784xf32, #tpu.memory_space<vmem>>) attributes {dimension_semantics = [#tpu.dimension_semantics<parallel>], iteration_bounds = array<i64: 1>, scalar_prefetch = 0 : i64, scratch_operands = 0 : i64, tpu.core_type = #tpu.core_type<tc>, window_params = [{transform_indices = @transform_0, window_bounds = array<i64: 8, 20>}, {pipeline_mode = #tpu.pipeline_mode<synchronous>, transform_indices = @transform_1, window_bounds = array<i64: 20, 512>}, {pipeline_mode = #tpu.pipeline_mode<synchronous>, transform_indices = @transform_2, window_bounds = array<i64: 1, 512>}, {pipeline_mode = #tpu.pipeline_mode<synchronous>, transform_indices = @transform_3, window_bounds = array<i64: 512, 896>}, {pipeline_mode = #tpu.pipeline_mode<synchronous>, transform_indices = @transform_4, window_bounds = array<i64: 1, 896>}, {transform_indices = @transform_5, window_bounds = array<i64: 8, 784>}]} {
    %c0 = arith.constant 0 : index
    %c0_0 = arith.constant 0 : index
    %0 = vector.load %arg1[%c0, %c0_0] : memref<8x20xf32, #tpu.memory_space<vmem>>, vector<8x20xf32>
    %1 = arith.truncf %0 : vector<8x20xf32> to vector<8x20xbf16>
    %c0_1 = arith.constant 0 : index
    %c0_2 = arith.constant 0 : index
    %2 = vector.load %arg2[%c0_1, %c0_2] : memref<20x512xbf16, #tpu.memory_space<vmem>>, vector<20x512xbf16>
    %cst = arith.constant dense<0.000000e+00> : vector<8x512xf32>
    %3 = tpu.matmul %1, %2, %cst {dimension_numbers = #tpu.dot_dimension_numbers<[1], [0], [0], [1], [0, 0, 1, 1], [], []>} : vector<8x20xbf16>, vector<20x512xbf16>, vector<8x512xf32> -> vector<8x512xf32>
    %c0_3 = arith.constant 0 : index
    %c0_4 = arith.constant 0 : index
    %4 = vector.load %arg3[%c0_3, %c0_4] : memref<1x512xf32, #tpu.memory_space<vmem>>, vector<1x512xf32>
    %5 = vector.broadcast %4 : vector<1x512xf32> to vector<8x512xf32>
    %6 = arith.addf %3, %5 : vector<8x512xf32>
    %7 = math.tanh %6 : vector<8x512xf32>
    %8 = arith.truncf %7 : vector<8x512xf32> to vector<8x512xbf16>
    %c0_5 = arith.constant 0 : index
    %c0_6 = arith.constant 0 : index
    %9 = vector.load %arg4[%c0_5, %c0_6] : memref<512x896xbf16, #tpu.memory_space<vmem>>, vector<512x896xbf16>
    %cst_7 = arith.constant dense<0.000000e+00> : vector<8x896xf32>
    %10 = tpu.matmul %8, %9, %cst_7 {dimension_numbers = #tpu.dot_dimension_numbers<[1], [0], [0], [1], [0, 0, 1, 1], [], []>} : vector<8x512xbf16>, vector<512x896xbf16>, vector<8x896xf32> -> vector<8x896xf32>
    %c0_8 = arith.constant 0 : index
    %c0_9 = arith.constant 0 : index
    %11 = vector.load %arg5[%c0_8, %c0_9] : memref<1x896xf32, #tpu.memory_space<vmem>>, vector<1x896xf32>
    %12 = vector.broadcast %11 : vector<1x896xf32> to vector<8x896xf32>
    %13 = arith.addf %10, %12 : vector<8x896xf32>
    %14 = vector.extract_strided_slice %13 {offsets = [0, 0], sizes = [8, 784], strides = [1, 1]} : vector<8x896xf32> to vector<8x784xf32>
    %15 = arith.negf %14 : vector<8x784xf32>
    %16 = math.exp %15 : vector<8x784xf32>
    %cst_10 = arith.constant 1.000000e+00 : f32
    %17 = vector.broadcast %cst_10 : f32 to vector<8x784xf32>
    %18 = arith.addf %17, %16 : vector<8x784xf32>
    %19 = arith.divf %17, %18 : vector<8x784xf32>
    %c0_11 = arith.constant 0 : index
    %c0_12 = arith.constant 0 : index
    %20 = vector.load %arg6[%c0_11, %c0_12] : memref<8x784xf32, #tpu.memory_space<vmem>>, vector<8x784xf32>
    tpu.vector_store %arg6[%c0_11, %c0_12], %19 {strides = array<i32>} : memref<8x784xf32, #tpu.memory_space<vmem>>, vector<8x784xf32>,
    return
  }
  func.func @transform_0(%arg0: i32) -> (i32, i32) {
    %c0_i32 = arith.constant 0 : i32
    %c0_i32_0 = arith.constant 0 : i32
    return %arg0, %c0_i32 : i32, i32
  }
  func.func @transform_1(%arg0: i32) -> (i32, i32) {
    %c0_i32 = arith.constant 0 : i32
    %c0_i32_0 = arith.constant 0 : i32
    %c0_i32_1 = arith.constant 0 : i32
    return %c0_i32, %c0_i32_0 : i32, i32
  }
  func.func @transform_2(%arg0: i32) -> (i32, i32) {
    %c0_i32 = arith.constant 0 : i32
    %c0_i32_0 = arith.constant 0 : i32
    %c0_i32_1 = arith.constant 0 : i32
    return %c0_i32, %c0_i32_0 : i32, i32
  }
  func.func @transform_3(%arg0: i32) -> (i32, i32) {
    %c0_i32 = arith.constant 0 : i32
    %c0_i32_0 = arith.constant 0 : i32
    %c0_i32_1 = arith.constant 0 : i32
    return %c0_i32, %c0_i32_0 : i32, i32
  }
  func.func @transform_4(%arg0: i32) -> (i32, i32) {
    %c0_i32 = arith.constant 0 : i32
    %c0_i32_0 = arith.constant 0 : i32
    %c0_i32_1 = arith.constant 0 : i32
    return %c0_i32, %c0_i32_0 : i32, i32
  }
  func.func @transform_5(%arg0: i32) -> (i32, i32) {
    %c0_i32 = arith.constant 0 : i32
    %c0_i32_0 = arith.constant 0 : i32
    return %arg0, %c0_i32 : i32, i32
  }
}

</mosaic_0001>

<bundles_post_ra>
// kernel: decoder_forward.1
= control target key start
LH: loop header
LB: loop body
LE: loop exit
PB: predicated region body
PF: predicated region fallthrough
CT: control target
= control target key end

     0   :  { %10 = vsyncpa [#allocation3], 0  ;;  %s2965_s0 = inlined_call_operand.hbm [shape: f32[8,20], index: 0, kind: input, shape index: {}]   ;;  %s2966_s1 = inlined_call_operand.hbm [shape: bf16[20,512], index: 1, kind: input, shape index: {}]   ;;  %s2967_s2 = inlined_call_operand.hbm [shape: f32[1,512], index: 2, kind: input, shape index: {}]   ;;  %s2968_s3 = inlined_call_operand.hbm [shape: bf16[512,896], index: 3, kind: input, shape index: {}]   ;;  %s2969_s4 = inlined_call_operand.vmem [shape: f32[1,896], index: 4, kind: input, shape index: {}]   ;;  %s2970_s5 = inlined_call_operand.hbm [shape: f32[8,784], index: 5, kind: output, shape index: {}]  }
   0x1   :  { %11 = vsyncpa [#allocation6], 0 }
   0x2   :  { %12 = vsyncpa [#allocation9], 0 }
   0x3   :  { %13 = vsyncpa [#allocation4], 0  ;;  %s2849_s18 = smov [#allocation5]  }
   0x4   :  { %s29_s19 = sshll.u32 %s2849_s18, 4  ;;  %s30_s19 = int_to_ptr.vmem [resolvable:$true] %s29_s19 }
   0x5   :  { %s2749_s20 = scalar_lea.vmem %s30_s19, 768  ;;  %p2754_p1 = scmp.lt.s32.totalorder %s30_s19, %s30_s19 }
   0x6   :  { %p2750_p0 = scmp.ne.s32.totalorder %s30_s19, %s2749_s20  ;;  %p2755_p2 = scmp.lt.s32.totalorder %s2749_s20, %s2749_s20 }
   0x8   :  { %p2756_p3 = por %p2755_p2, %p2754_p1 }
   0xa   :  { %p2757_p4 = pnand %p2756_p3, %p2750_p0 }
   0xc   :  { %2760 = shalt.err (!%p2757_p4)
}
   0xd   :  { %s2850_s21 = smov 256   ;;  %s2851_s22 = smov 16  }
   0xe   :  { %35 = dma.hbm_to_vmem [thread:$0]  %s2966_s1, 768, %s30_s19, [#allocation6], %s2850_s21, %s2850_s21, %s2851_s22  }
   0xf   :  { %s2852_s25 = smov [#allocation2]   ;;  %s2853_s27 = smov [#allocation7]  }
  0x10   :  { %s20_s26 = sshll.u32 %s2852_s25, 4  ;;  %s42_s28 = sshll.u32 %s2853_s27, 4  ;;  %s21_s26 = int_to_ptr.vmem [resolvable:$true] %s20_s26  ;;  %s43_s28 = int_to_ptr.vmem [resolvable:$true] %s42_s28 }
  0x11   :  { %s2769_s29 = scalar_lea.vmem %s21_s26, 128  ;;  %p2774_p6 = scmp.lt.s32.totalorder %s21_s26, %s21_s26 }
  0x12   :  { %p2770_p5 = scmp.ne.s32.totalorder %s21_s26, %s2769_s29  ;;  %p2775_p7 = scmp.lt.s32.totalorder %s2769_s29, %s2769_s29 }
  0x14   :  { %p2776_p8 = por %p2775_p7, %p2774_p6 }
  0x16   :  { %p2777_p9 = pnand %p2776_p8, %p2770_p5 }
  0x18   :  { %2780 = shalt.err (!%p2777_p9)
}
  0x19   :  { %23 = dma.hbm_to_vmem [thread:$0]  %s2965_s0, 128, %s21_s26, [#allocation3]  }
  0x1a   :  { %s2789_s7 = scalar_lea.vmem %s43_s28, 64  ;;  %p2794_p11 = scmp.lt.s32.totalorder %s43_s28, %s43_s28 }
  0x1b   :  { %p2790_p10 = scmp.ne.s32.totalorder %s43_s28, %s2789_s7  ;;  %p2795_p12 = scmp.lt.s32.totalorder %s2789_s7, %s2789_s7 }
  0x1d   :  { %p2796_p13 = por %p2795_p12, %p2794_p11 }
  0x1f   :  { %p2797_p0 = pnand %p2796_p13, %p2790_p10 }
  0x21   :  { %2800 = shalt.err (!%p2797_p0)
}
  0x22   :  { %45 = dma.hbm_to_vmem [thread:$0]  %s2967_s2, 64, %s43_s28, [#allocation6]  }
  0x23   :  { %s2854_s9 = smov [#allocation8]  }
  0x24   :  { %s51_s10 = sshll.u32 %s2854_s9, 4  ;;  %s52_s10 = int_to_ptr.vmem [resolvable:$true] %s51_s10 }
  0x25   :  { %s2809_s11 = scalar_lea.vmem %s52_s10, 28672  ;;  %p2814_p2 = scmp.lt.s32.totalorder %s52_s10, %s52_s10 }
  0x26   :  { %p2810_p1 = scmp.ne.s32.totalorder %s52_s10, %s2809_s11  ;;  %p2815_p3 = scmp.lt.s32.totalorder %s2809_s11, %s2809_s11 }
  0x28   :  { %p2816_p4 = por %p2815_p3, %p2814_p2 }
  0x2a   :  { %p2817_p5 = pnand %p2816_p4, %p2810_p1 }
  0x2c   :  { %2820 = shalt.err (!%p2817_p5)
}
  0x2d   :  { %s2855_s0 = smov 448   ;;  %s2856_s12 = smov 28  }
  0x2e   :  { %57 = dma.hbm_to_vmem [thread:$0]  %s2968_s3, 28672, %s52_s10, [#allocation9], %s2855_s0, %s2855_s0, %s2856_s12  }
  0x2f   :  { %2841 = dma.done.wait [#allocation3], 128  }
  0x30   :  { %2842 = vsyncadd [#allocation3], 4294967168 }
  0x31   :  { %2843 = dma.done.wait [#allocation6], 832  }
  0x32   :  { %2844 = vsyncadd [#allocation6], 4294966464 }
  0x33   :  { %2845 = dma.done.wait [#allocation9], 28672  }
  0x34   :  { %2846 = vsyncadd [#allocation9], 4294938624  ;;  %v2857_v0 = vmov 0   ;;  %v79_v1 = vld [vmem:[#allocation5 + $0x20] sm:$0x33]  ;;  %vm137_vm0 = vcmask 1041408  }
  0x35   :  { %182 = vmatprep.mubr.bf16.mxu0 %v2857_v0  ;;  %223 = vmatprep.mubr.bf16.mxu1 %v2857_v0  ;;  %v80_v2 = vld [vmem:[#allocation5 + $0x28] sm:$0x33]  ;;  %v2083_v3 = vcombine.high %v79_v1, %v79_v1  ;;  %v2082_v5 = vcombine.low %v79_v1, %v79_v1  ;;  %v2379_v7 = vld [vmem:[#allocation5 + $0x4] ss:$16 sps:$4 sm:$0xff]   ;;  %v2383_v11 = vld [vmem:[#allocation5] ss:$16 sps:$4 sm:$0xff]  }
  0x36   :  { %v2085_v4 = vcombine.high %v80_v2, %v80_v2  ;;  %v2084_v6 = vcombine.low %v80_v2, %v80_v2  ;;  %v2381_v8 = vld [vmem:[#allocation5 + $0xc] ss:$16 sps:$4 sm:$0xff]   ;;  %v2384_v12 = vld [vmem:[#allocation5 + $0x8] ss:$16 sps:$4 sm:$0xff]   ;;  %vm133_vm1 = vcmask 162816   ;;  %vm2059_vm2 = vcmask 130048  }
  0x37   :  { %2086 = vmatprep.subr.msk.bf16.mxu0 %vm137_vm0, %v2083_v3  ;;  %v139_v9 = vsel %vm137_vm0, %v2082_v5, 0  ;;  %v73_v13 = vld [vmem:[#allocation2] sm:$0xff]  ;;  %v2393_v19 = vld [vmem:[#allocation8 + $0x154] ss:$28 sps:$4 sm:$0xff]   ;;  %v2399_v23 = vld [vmem:[#allocation8 + $0x11c] ss:$28 sps:$4 sm:$0xff]  }
  0x38   :  { %2088 = vmatprep.subr.msk.bf16.mxu1 %vm137_vm0, %v2085_v4  ;;  %v145_v10 = vsel %vm137_vm0, %v2084_v6, 0  ;;  %163 = vmatpush1.bf16.msra.mxu0 %v139_v9  ;;  %v2387_v14 = vld [vmem:[#allocation8 + $0x18c] ss:$28 sps:$4 sm:$0xff]   ;;  %v74_v16 = vpack.c.bf16 %v73_v13, %v73_v13  ;;  %v2396_v20 = vld [vmem:[#allocation8 + $0x4d4] ss:$28 sps:$4 sm:$0xff]  }
  0x39   :  { %204 = vmatpush1.bf16.msra.mxu1 %v145_v10  ;;  %164 = vmatprep.subr.bf16.mxu0 %v2379_v7  ;;  %v2390_v15 = vld [vmem:[#allocation8 + $0x50c] ss:$28 sps:$4 sm:$0xff]   ;;  %v2402_v24 = vld [vmem:[#allocation8 + $0x49c] ss:$28 sps:$4 sm:$0xff]   ;;  %v2405_v27 = vld [vmem:[#allocation8 + $0xe4] ss:$28 sps:$4 sm:$0xff]  }
  0x3a   :  { %205 = vmatprep.subr.bf16.mxu1 %v2381_v8  ;;  %v2385_v17 = vld [vmem:[#allocation8 + $0x188] ss:$28 sps:$4 sm:$0xff]   ;;  %v2391_v21 = vld [vmem:[#allocation8 + $0x150] ss:$28 sps:$4 sm:$0xff]   ;;  %v2397_v25 = vld [vmem:[#allocation8 + $0x118] ss:$28 sps:$4 sm:$0xff]  }
  0x3b   :  { %v2388_v18 = vld [vmem:[#allocation8 + $0x508] ss:$28 sps:$4 sm:$0xff]   ;;  %v2394_v22 = vld [vmem:[#allocation8 + $0x4d0] ss:$28 sps:$4 sm:$0xff]   ;;  %v2400_v26 = vld [vmem:[#allocation8 + $0x498] ss:$28 sps:$4 sm:$0xff]  }
  0x3c   :  { %165 = vmatpush1.bf16.msra.mxu0 %v2383_v11  ;;  %v2408_v28 = vld [vmem:[#allocation8 + $0x464] ss:$28 sps:$4 sm:$0xff]   ;;  %v2411_v31 = vld [vmem:[#allocation8 + $0xac] ss:$28 sps:$4 sm:$0xff]   ;;  %v2417_v35 = vld [vmem:[#allocation8 + $0x74] ss:$28 sps:$4 sm:$0xff]  }
  0x3d   :  { %206 = vmatpush1.bf16.msra.mxu1 %v2384_v12  ;;  %1685 = vmatprep.subr.bf16.mxu0 %v2387_v14  ;;  %v2403_v29 = vld [vmem:[#allocation8 + $0xe0] ss:$28 sps:$4 sm:$0xff]   ;;  %v2414_v32 = vld [vmem:[#allocation8 + $0x42c] ss:$28 sps:$4 sm:$0xff]   ;;  %v2420_v36 = vld [vmem:[#allocation8 + $0x3f4] ss:$28 sps:$4 sm:$0xff]  }
  0x3e   :  { %1726 = vmatprep.subr.bf16.mxu1 %v2390_v15  ;;  %v2406_v30 = vld [vmem:[#allocation8 + $0x460] ss:$28 sps:$4 sm:$0xff]   ;;  %v2409_v33 = vld [vmem:[#allocation8 + $0xa8] ss:$28 sps:$4 sm:$0xff]   ;;  %v2415_v37 = vld [vmem:[#allocation8 + $0x70] ss:$28 sps:$4 sm:$0xff]  }
  0x3f   :  { %2087 = vmatmul.mubr.msk.bf16.vlgmr.msra.gmra.mxu0 %vm133_vm1, %v74_v16  ;;  %v2412_v34 = vld [vmem:[#allocation8 + $0x428] ss:$28 sps:$4 sm:$0xff]   ;;  %v2418_v38 = vld [vmem:[#allocation8 + $0x3f0] ss:$28 sps:$4 sm:$0xff]   ;;  %v2423_v39 = vld [vmem:[#allocation8 + $0x3c] ss:$28 sps:$4 sm:$0xff]  }
  0x40   :  { %2089 = vmatmul.mubr.msk.bf16.vlgmr.msra.gmra.mxu1 %vm133_vm1, %v74_v16  ;;  %1686 = vmatpush1.bf16.msra.mxu0 %v2385_v17  ;;  %v2426_v40 = vld [vmem:[#allocation8 + $0x3bc] ss:$28 sps:$4 sm:$0xff]   ;;  %v2429_v43 = vld [vmem:[#allocation8 + $0x4] ss:$28 sps:$4 sm:$0xff]   ;;  %v2435_v47 = vld [vmem:[#allocation8 + $0x34c] ss:$28 sps:$4 sm:$0xff]   ;;  %v83_v17 = vlaneseq }
  0x41   :  { %1727 = vmatpush1.bf16.msra.mxu1 %v2388_v18  ;;  %1687 = vmatprep.subr.bf16.mxu0 %v2393_v19  ;;  %v2421_v41 = vld [vmem:[#allocation8 + $0x38] ss:$28 sps:$4 sm:$0xff]   ;;  %v2432_v44 = vld [vmem:[#allocation8 + $0x384] ss:$28 sps:$4 sm:$0xff]   ;;  %v2438_v48 = vld [vmem:[#allocation8 + $0x6cc] ss:$28 sps:$4 sm:$0xff]  }
  0x42   :  { %1728 = vmatprep.subr.bf16.mxu1 %v2396_v20  ;;  %v2424_v42 = vld [vmem:[#allocation8 + $0x3b8] ss:$28 sps:$4 sm:$0xff]   ;;  %v2427_v45 = vld [vmem:[#allocation8] ss:$28 sps:$4 sm:$0xff]   ;;  %v2433_v49 = vld [vmem:[#allocation8 + $0x348] ss:$28 sps:$4 sm:$0xff]  }
  0x43   :  { %v2430_v46 = vld [vmem:[#allocation8 + $0x380] ss:$28 sps:$4 sm:$0xff]   ;;  %v2436_v50 = vld [vmem:[#allocation8 + $0x6c8] ss:$28 sps:$4 sm:$0xff]   ;;  %v2441_v51 = vld [vmem:[#allocation8 + $0x314] ss:$28 sps:$4 sm:$0xff]  }
  0x44   :  { %1688 = vmatpush1.bf16.msra.mxu0 %v2391_v21  ;;  %v2444_v52 = vld [vmem:[#allocation8 + $0x694] ss:$28 sps:$4 sm:$0xff]   ;;  %v2447_v55 = vld [vmem:[#allocation8 + $0x2dc] ss:$28 sps:$4 sm:$0xff]   ;;  %v2453_v59 = vld [vmem:[#allocation8 + $0x2a4] ss:$28 sps:$4 sm:$0xff]  }
  0x45   :  { %1729 = vmatpush1.bf16.msra.mxu1 %v2394_v22  ;;  %1689 = vmatprep.subr.bf16.mxu0 %v2399_v23  ;;  %v2439_v53 = vld [vmem:[#allocation8 + $0x310] ss:$28 sps:$4 sm:$0xff]   ;;  %v2450_v56 = vld [vmem:[#allocation8 + $0x65c] ss:$28 sps:$4 sm:$0xff]   ;;  %v2456_v60 = vld [vmem:[#allocation8 + $0x624] ss:$28 sps:$4 sm:$0xff]  }
  0x46   :  { %1730 = vmatprep.subr.bf16.mxu1 %v2402_v24  ;;  %v2442_v54 = vld [vmem:[#allocation8 + $0x690] ss:$28 sps:$4 sm:$0xff]   ;;  %v2445_v57 = vld [vmem:[#allocation8 + $0x2d8] ss:$28 sps:$4 sm:$0xff]   ;;  %v2451_v61 = vld [vmem:[#allocation8 + $0x2a0] ss:$28 sps:$4 sm:$0xff]  }
  0x47   :  { %v2448_v58 = vld [vmem:[#allocation8 + $0x658] ss:$28 sps:$4 sm:$0xff]   ;;  %v2454_v62 = vld [vmem:[#allocation8 + $0x620] ss:$28 sps:$4 sm:$0xff]   ;;  %v2459_v63 = vld [vmem:[#allocation8 + $0x26c] ss:$28 sps:$4 sm:$0xff]  }
  0x48   :  { %1690 = vmatpush1.bf16.msra.mxu0 %v2397_v25  ;;  %v2462_v0 = vld [vmem:[#allocation8 + $0x5ec] ss:$28 sps:$4 sm:$0xff]   ;;  %v2465_v3 = vld [vmem:[#allocation8 + $0x234] ss:$28 sps:$4 sm:$0xff]   ;;  %v2471_v7 = vld [vmem:[#allocation8 + $0x1fc] ss:$28 sps:$4 sm:$0xff]  }
  0x49   :  { %1731 = vmatpush1.bf16.msra.mxu1 %v2400_v26  ;;  %1691 = vmatprep.subr.bf16.mxu0 %v2405_v27  ;;  %v2457_v1 = vld [vmem:[#allocation8 + $0x268] ss:$28 sps:$4 sm:$0xff]   ;;  %v2468_v4 = vld [vmem:[#allocation8 + $0x5b4] ss:$28 sps:$4 sm:$0xff]   ;;  %v2474_v8 = vld [vmem:[#allocation8 + $0x57c] ss:$28 sps:$4 sm:$0xff]  }
  0x4a   :  { %1732 = vmatprep.subr.bf16.mxu1 %v2408_v28  ;;  %v2460_v2 = vld [vmem:[#allocation8 + $0x5e8] ss:$28 sps:$4 sm:$0xff]   ;;  %v2463_v5 = vld [vmem:[#allocation8 + $0x230] ss:$28 sps:$4 sm:$0xff]   ;;  %v2469_v9 = vld [vmem:[#allocation8 + $0x1f8] ss:$28 sps:$4 sm:$0xff]  }
  0x4b   :  { %v2466_v6 = vld [vmem:[#allocation8 + $0x5b0] ss:$28 sps:$4 sm:$0xff]   ;;  %v2472_v10 = vld [vmem:[#allocation8 + $0x578] ss:$28 sps:$4 sm:$0xff]   ;;  %v2477_v11 = vld [vmem:[#allocation8 + $0x1c4] ss:$28 sps:$4 sm:$0xff]  }
  0x4c   :  { %1692 = vmatpush1.bf16.msra.mxu0 %v2403_v29  ;;  %v2480_v12 = vld [vmem:[#allocation8 + $0x544] ss:$28 sps:$4 sm:$0xff]   ;;  %v2483_v15 = vld [vmem:[#allocation8 + $0x194] ss:$28 sps:$4 sm:$0xff]   ;;  %v2901_v18 = vshrl.u32 %v83_v17, 7 }
  0x4d   :  { %1733 = vmatpush1.bf16.msra.mxu1 %v2406_v30  ;;  %1693 = vmatprep.subr.bf16.mxu0 %v2411_v31  ;;  %v2475_v13 = vld [vmem:[#allocation8 + $0x1c0] ss:$28 sps:$4 sm:$0xff]   ;;  %v2486_v16 = vld [vmem:[#allocation8 + $0x514] ss:$28 sps:$4 sm:$0xff]  }
  0x4e   :  { %1734 = vmatprep.subr.bf16.mxu1 %v2414_v32  ;;  %v2478_v14 = vld [vmem:[#allocation8 + $0x540] ss:$28 sps:$4 sm:$0xff]   ;;  %v85_v19 = vsub.s32 0, %v2901_v18  ;;  %v93_v20 = vsub.s32 2, %v2901_v18  ;;  %v89_v22 = vsub.s32 1, %v2901_v18  ;;  %v97_v23 = vsub.s32 3, %v2901_v18 }
  0x4f   :  { %v81_v21 = vld [vmem:[#allocation7] sm:$0xf]  ;;  %v2532_v17 = vld [vmem:[#allocation8 + $0x6d0] ss:$28 sps:$4 sm:$0xff]  }
  0x50   :  { %1694 = vmatpush1.bf16.msra.mxu0 %v2409_v33  ;;  %v86_v24 = vrot.slane %v81_v21, %v85_v19  ;;  %v94_v25 = vrot.slane %v81_v21, %v93_v20  ;;  %v90_v26 = vrot.slane %v81_v21, %v89_v22  ;;  %v98_v27 = vrot.slane %v81_v21, %v97_v23  ;;  %v2537_v21 = vld [vmem:[#allocation8 + $0x31c] ss:$28 sps:$4 sm:$0xff]  }
  0x51   :  { %1735 = vmatpush1.bf16.msra.mxu1 %v2412_v34  ;;  %1695 = vmatprep.subr.bf16.mxu0 %v2417_v35 }
  0x52   :  { %1736 = vmatprep.subr.bf16.mxu1 %v2420_v36 }
  0x54   :  { %1696 = vmatpush1.bf16.msra.mxu0 %v2415_v37 }
  0x55   :  { %1737 = vmatpush1.bf16.msra.mxu1 %v2418_v38  ;;  %1697 = vmatprep.subr.bf16.mxu0 %v2423_v39 }
  0x56   :  { %1738 = vmatprep.subr.bf16.mxu1 %v2426_v40 }
  0x58   :  { %1698 = vmatpush1.bf16.msra.mxu0 %v2421_v41 }
  0x59   :  { %1739 = vmatpush1.bf16.msra.mxu1 %v2424_v42  ;;  %1699 = vmatprep.subr.bf16.mxu0 %v2429_v43 }
  0x5a   :  { %1740 = vmatprep.subr.bf16.mxu1 %v2432_v44 }
  0x5c   :  { %1700 = vmatpush1.bf16.msra.mxu0 %v2427_v45 }
  0x5d   :  { %1741 = vmatpush1.bf16.msra.mxu1 %v2430_v46  ;;  %1701 = vmatprep.subr.bf16.mxu0 %v2435_v47  ;;  %v2481_v46 = vld [vmem:[#allocation8 + $0x190] ss:$28 sps:$4 sm:$0xff]  }
  0x5e   :  { %1742 = vmatprep.subr.bf16.mxu1 %v2438_v48 }
  0x60   :  { %1702 = vmatpush2.bf16.msra.mxu0 %v2433_v49  ;;  %v2484_v49 = vld [vmem:[#allocation8 + $0x510] ss:$28 sps:$4 sm:$0xff]  }
  0x61   :  { %1743 = vmatpush2.bf16.msra.mxu1 %v2436_v50  ;;  %1703 = vmatprep.subr.bf16.mxu0 %v2441_v51  ;;  %v2489_v50 = vld [vmem:[#allocation8 + $0x15c] ss:$28 sps:$4 sm:$0xff]  }
  0x62   :  { %1744 = vmatprep.subr.bf16.mxu1 %v2444_v52  ;;  %v2492_v51 = vld [vmem:[#allocation8 + $0x4dc] ss:$28 sps:$4 sm:$0xff]  }
  0x63   :  { %v2487_v52 = vld [vmem:[#allocation8 + $0x158] ss:$28 sps:$4 sm:$0xff]  }
  0x64   :  { %1704 = vmatpush2.bf16.msra.mxu0 %v2439_v53  ;;  %v2490_v53 = vld [vmem:[#allocation8 + $0x4d8] ss:$28 sps:$4 sm:$0xff]  }
  0x65   :  { %1745 = vmatpush2.bf16.msra.mxu1 %v2442_v54  ;;  %1705 = vmatprep.subr.bf16.mxu0 %v2447_v55  ;;  %v2495_v54 = vld [vmem:[#allocation8 + $0x124] ss:$28 sps:$4 sm:$0xff]  }
  0x66   :  { %1746 = vmatprep.subr.bf16.mxu1 %v2450_v56  ;;  %v2498_v55 = vld [vmem:[#allocation8 + $0x4a4] ss:$28 sps:$4 sm:$0xff]  }
  0x67   :  { %v2493_v56 = vld [vmem:[#allocation8 + $0x120] ss:$28 sps:$4 sm:$0xff]  }
  0x68   :  { %1706 = vmatpush2.bf16.msra.mxu0 %v2445_v57  ;;  %v2496_v57 = vld [vmem:[#allocation8 + $0x4a0] ss:$28 sps:$4 sm:$0xff]  }
  0x69   :  { %1747 = vmatpush2.bf16.msra.mxu1 %v2448_v58  ;;  %1707 = vmatprep.subr.bf16.mxu0 %v2453_v59  ;;  %v2501_v58 = vld [vmem:[#allocation8 + $0xec] ss:$28 sps:$4 sm:$0xff]  }
  0x6a   :  { %1748 = vmatprep.subr.bf16.mxu1 %v2456_v60  ;;  %v2504_v59 = vld [vmem:[#allocation8 + $0x46c] ss:$28 sps:$4 sm:$0xff]  }
  0x6b   :  { %v2499_v60 = vld [vmem:[#allocation8 + $0xe8] ss:$28 sps:$4 sm:$0xff]  }
  0x6c   :  { %1708 = vmatpush2.bf16.msra.mxu0 %v2451_v61  ;;  %v2502_v61 = vld [vmem:[#allocation8 + $0x468] ss:$28 sps:$4 sm:$0xff]  }
  0x6d   :  { %1749 = vmatpush2.bf16.msra.mxu1 %v2454_v62  ;;  %1709 = vmatprep.subr.bf16.mxu0 %v2459_v63  ;;  %v2507_v62 = vld [vmem:[#allocation8 + $0xb4] ss:$28 sps:$4 sm:$0xff]  }
  0x6e   :  { %1750 = vmatprep.subr.bf16.mxu1 %v2462_v0  ;;  %v2510_v63 = vld [vmem:[#allocation8 + $0x434] ss:$28 sps:$4 sm:$0xff]  }
  0x6f   :  { %v2505_v0 = vld [vmem:[#allocation8 + $0xb0] ss:$28 sps:$4 sm:$0xff]  }
  0x70   :  { %1710 = vmatpush2.bf16.msra.mxu0 %v2457_v1  ;;  %v2508_v1 = vld [vmem:[#allocation8 + $0x430] ss:$28 sps:$4 sm:$0xff]  }
  0x71   :  { %1751 = vmatpush2.bf16.msra.mxu1 %v2460_v2  ;;  %1711 = vmatprep.subr.bf16.mxu0 %v2465_v3  ;;  %v2513_v2 = vld [vmem:[#allocation8 + $0x7c] ss:$28 sps:$4 sm:$0xff]  }
  0x72   :  { %1752 = vmatprep.subr.bf16.mxu1 %v2468_v4  ;;  %v2516_v3 = vld [vmem:[#allocation8 + $0x3fc] ss:$28 sps:$4 sm:$0xff]  }
  0x73   :  { %v2511_v4 = vld [vmem:[#allocation8 + $0x78] ss:$28 sps:$4 sm:$0xff]  }
  0x74   :  { %1712 = vmatpush2.bf16.msra.mxu0 %v2463_v5  ;;  %v2514_v5 = vld [vmem:[#allocation8 + $0x3f8] ss:$28 sps:$4 sm:$0xff]  }
  0x75   :  { %1753 = vmatpush2.bf16.msra.mxu1 %v2466_v6  ;;  %1713 = vmatprep.subr.bf16.mxu0 %v2471_v7  ;;  %v2519_v6 = vld [vmem:[#allocation8 + $0x44] ss:$28 sps:$4 sm:$0xff]  }
  0x76   :  { %1754 = vmatprep.subr.bf16.mxu1 %v2474_v8  ;;  %v2522_v7 = vld [vmem:[#allocation8 + $0x3c4] ss:$28 sps:$4 sm:$0xff]  }
  0x77   :  { %v2517_v8 = vld [vmem:[#allocation8 + $0x40] ss:$28 sps:$4 sm:$0xff]  }
  0x78   :  { %1714 = vmatpush2.bf16.msra.mxu0 %v2469_v9  ;;  %v2520_v9 = vld [vmem:[#allocation8 + $0x3c0] ss:$28 sps:$4 sm:$0xff]  }
  0x79   :  { %1755 = vmatpush2.bf16.msra.mxu1 %v2472_v10  ;;  %1715 = vmatprep.subr.bf16.mxu0 %v2477_v11  ;;  %v2525_v10 = vld [vmem:[#allocation8 + $0xc] ss:$28 sps:$4 sm:$0xff]  }
  0x7a   :  { %1756 = vmatprep.subr.bf16.mxu1 %v2480_v12  ;;  %v2528_v11 = vld [vmem:[#allocation8 + $0x38c] ss:$28 sps:$4 sm:$0xff]  }
  0x7b   :  { %v2523_v12 = vld [vmem:[#allocation8 + $0x8] ss:$28 sps:$4 sm:$0xff]  }
  0x7c   :  { %1716 = vmatpush2.bf16.msra.mxu0 %v2475_v13  ;;  %v2526_v13 = vld [vmem:[#allocation8 + $0x388] ss:$28 sps:$4 sm:$0xff]  }
  0x7d   :  { %1757 = vmatpush2.bf16.msra.mxu1 %v2478_v14  ;;  %1767 = vmatprep.subr.bf16.mxu0 %v2483_v15  ;;  %v2531_v14 = vld [vmem:[#allocation8 + $0x354] ss:$28 sps:$4 sm:$0xff]  }
  0x7e   :  { %1808 = vmatprep.subr.bf16.mxu1 %v2486_v16  ;;  %v2534_v15 = vld [vmem:[#allocation8 + $0x6d4] ss:$28 sps:$4 sm:$0xff]  }
  0x7f   :  { %v2529_v16 = vld [vmem:[#allocation8 + $0x350] ss:$28 sps:$4 sm:$0xff]  }
  0xff   :  { %v184_v28 = vpop.f32.mrf.mxu0 }
 0x100   :  { %v225_v29 = vpop.f32.mrf.mxu1  ;;  %v185_v30 = vadd.f32 %v184_v28, %v86_v24  ;;  %v2540_v24 = vld [vmem:[#allocation8 + $0x69c] ss:$28 sps:$4 sm:$0xff]   ;;  %v2546_v28 = vld [vmem:[#allocation8 + $0x664] ss:$28 sps:$4 sm:$0xff]  }
 0x101   :  { %v226_v31 = vadd.f32 %v225_v29, %v94_v25  ;;  %v186_v32 = vpop.f32.mrf.mxu0  ;;  %v2535_v25 = vld [vmem:[#allocation8 + $0x318] ss:$28 sps:$4 sm:$0xff]   ;;  %v2541_v29 = vld [vmem:[#allocation8 + $0x2e0] ss:$28 sps:$4 sm:$0xff]  }
 0x102   :  { %v227_v33 = vpop.f32.mrf.mxu1  ;;  %2705 = vtanh.f32 %v185_v30  ;;  %v187_v34 = vadd.f32 %v186_v32, %v90_v26  ;;  %v2538_v26 = vld [vmem:[#allocation8 + $0x698] ss:$28 sps:$4 sm:$0xff]   ;;  %v2544_v30 = vld [vmem:[#allocation8 + $0x660] ss:$28 sps:$4 sm:$0xff]   ;;  %v2552_v32 = vld [vmem:[#allocation8 + $0x62c] ss:$28 sps:$4 sm:$0xff]  }
 0x103   :  { %v228_v35 = vadd.f32 %v227_v33, %v98_v27  ;;  %2707 = vtanh.f32 %v226_v31  ;;  %v188_v36 = vpop.f32.mrf.mxu0  ;;  %v2543_v27 = vld [vmem:[#allocation8 + $0x2e4] ss:$28 sps:$4 sm:$0xff]   ;;  %v2549_v31 = vld [vmem:[#allocation8 + $0x2ac] ss:$28 sps:$4 sm:$0xff]  }
 0x104   :  { %v229_v37 = vpop.f32.mrf.mxu1  ;;  %2709 = vtanh.f32 %v187_v34  ;;  %v2547_v33 = vld [vmem:[#allocation8 + $0x2a8] ss:$28 sps:$4 sm:$0xff]   ;;  %v2558_v36 = vld [vmem:[#allocation8 + $0x5f4] ss:$28 sps:$4 sm:$0xff]  }
 0x105   :  { %2711 = vtanh.f32 %v228_v35  ;;  %v189_v38 = vpop.f32.mrf.mxu0  ;;  %v2550_v34 = vld [vmem:[#allocation8 + $0x628] ss:$28 sps:$4 sm:$0xff]   ;;  %v2555_v35 = vld [vmem:[#allocation8 + $0x274] ss:$28 sps:$4 sm:$0xff]  }
 0x106   :  { %v230_v39 = vpop.f32.mrf.mxu1  ;;  %v2553_v37 = vld [vmem:[#allocation8 + $0x270] ss:$28 sps:$4 sm:$0xff]  }
 0x107   :  { %v2556_v38 = vld [vmem:[#allocation8 + $0x5f0] ss:$28 sps:$4 sm:$0xff]   ;;  %v2561_v39 = vld [vmem:[#allocation8 + $0x23c] ss:$28 sps:$4 sm:$0xff]  }
 0x10f   :  { %v2706_v40 = vpop.eup %2705 }
 0x110   :  { %v2708_v41 = vpop.eup %2707  ;;  %v2919_v47 = vpack.c.bf16 %v2706_v40, %v2706_v40  ;;  %v2564_v40 = vld [vmem:[#allocation8 + $0x5bc] ss:$28 sps:$4 sm:$0xff]  }
 0x111   :  { %v2710_v42 = vpop.eup %2709  ;;  %v2915_v44 = vpack.c.bf16 %v2708_v41, %v2708_v41  ;;  %v2559_v41 = vld [vmem:[#allocation8 + $0x238] ss:$28 sps:$4 sm:$0xff]  }
 0x112   :  { %v2712_v43 = vpop.eup %2711  ;;  %v2917_v45 = vpack.c.bf16 %v2710_v42, %v2710_v42  ;;  %v2562_v42 = vld [vmem:[#allocation8 + $0x5b8] ss:$28 sps:$4 sm:$0xff]  }
 0x113   :  { %v2921_v48 = vpack.c.bf16 %v2712_v43, %v2712_v43  ;;  %v2567_v43 = vld [vmem:[#allocation8 + $0x204] ss:$28 sps:$4 sm:$0xff]  }
 0x114   :  { %1717 = vmatprep.mubr.bf16.mxu0 %v2917_v45 }
 0x115   :  { %1758 = vmatprep.mubr.bf16.mxu1 %v2921_v48  ;;  %1718 = vmatmul.mubr.bf16.vlgmr.msra.gmra.mxu0 %v2919_v47 }
 0x116   :  { %1759 = vmatmul.mubr.bf16.vlgmr.msra.gmra.mxu1 %v2915_v44  ;;  %1768 = vmatpush1.bf16.msra.mxu0 %v2481_v46  ;;  %v2570_v46 = vld [vmem:[#allocation8 + $0x584] ss:$28 sps:$4 sm:$0xff]  }
 0x117   :  { %1809 = vmatpush1.bf16.msra.mxu1 %v2484_v49  ;;  %1799 = vmatprep.mubr.bf16.mxu0 %v2917_v45  ;;  %v2565_v49 = vld [vmem:[#allocation8 + $0x200] ss:$28 sps:$4 sm:$0xff]  }
 0x118   :  { %1840 = vmatprep.mubr.bf16.mxu1 %v2921_v48  ;;  %1769 = vmatprep.subr.bf16.mxu0 %v2489_v50  ;;  %v2568_v50 = vld [vmem:[#allocation8 + $0x580] ss:$28 sps:$4 sm:$0xff]  }
 0x119   :  { %1810 = vmatprep.subr.bf16.mxu1 %v2492_v51  ;;  %v2573_v51 = vld [vmem:[#allocation8 + $0x1cc] ss:$28 sps:$4 sm:$0xff]  }
 0x11a   :  { %1770 = vmatpush1.bf16.msra.mxu0 %v2487_v52  ;;  %v2576_v52 = vld [vmem:[#allocation8 + $0x54c] ss:$28 sps:$4 sm:$0xff]  }
 0x11b   :  { %1811 = vmatpush1.bf16.msra.mxu1 %v2490_v53  ;;  %1771 = vmatprep.subr.bf16.mxu0 %v2495_v54  ;;  %v2571_v53 = vld [vmem:[#allocation8 + $0x1c8] ss:$28 sps:$4 sm:$0xff]  }
 0x11c   :  { %1812 = vmatprep.subr.bf16.mxu1 %v2498_v55  ;;  %v2574_v54 = vld [vmem:[#allocation8 + $0x548] ss:$28 sps:$4 sm:$0xff]   ;;  %v2579_v55 = vld [vmem:[#allocation8 + $0x19c] ss:$28 sps:$4 sm:$0xff]  }
 0x11e   :  { %1772 = vmatpush1.bf16.msra.mxu0 %v2493_v56  ;;  %v2582_v56 = vld [vmem:[#allocation8 + $0x51c] ss:$28 sps:$4 sm:$0xff]  }
 0x11f   :  { %1813 = vmatpush1.bf16.msra.mxu1 %v2496_v57  ;;  %1773 = vmatprep.subr.bf16.mxu0 %v2501_v58  ;;  %v2577_v57 = vld [vmem:[#allocation8 + $0x198] ss:$28 sps:$4 sm:$0xff]  }
 0x120   :  { %1814 = vmatprep.subr.bf16.mxu1 %v2504_v59  ;;  %v2580_v58 = vld [vmem:[#allocation8 + $0x518] ss:$28 sps:$4 sm:$0xff]   ;;  %v2585_v59 = vld [vmem:[#allocation8 + $0x164] ss:$28 sps:$4 sm:$0xff]  }
 0x122   :  { %1774 = vmatpush1.bf16.msra.mxu0 %v2499_v60  ;;  %v2588_v60 = vld [vmem:[#allocation8 + $0x4e4] ss:$28 sps:$4 sm:$0xff]  }
 0x123   :  { %1815 = vmatpush1.bf16.msra.mxu1 %v2502_v61  ;;  %1775 = vmatprep.subr.bf16.mxu0 %v2507_v62  ;;  %v2583_v61 = vld [vmem:[#allocation8 + $0x160] ss:$28 sps:$4 sm:$0xff]  }
 0x124   :  { %1816 = vmatprep.subr.bf16.mxu1 %v2510_v63  ;;  %v2586_v62 = vld [vmem:[#allocation8 + $0x4e0] ss:$28 sps:$4 sm:$0xff]   ;;  %v2591_v63 = vld [vmem:[#allocation8 + $0x12c] ss:$28 sps:$4 sm:$0xff]  }
 0x126   :  { %1776 = vmatpush1.bf16.msra.mxu0 %v2505_v0  ;;  %v2594_v0 = vld [vmem:[#allocation8 + $0x4ac] ss:$28 sps:$4 sm:$0xff]  }
 0x127   :  { %1817 = vmatpush1.bf16.msra.mxu1 %v2508_v1  ;;  %1777 = vmatprep.subr.bf16.mxu0 %v2513_v2  ;;  %v2589_v1 = vld [vmem:[#allocation8 + $0x128] ss:$28 sps:$4 sm:$0xff]  }
 0x128   :  { %1818 = vmatprep.subr.bf16.mxu1 %v2516_v3  ;;  %v2592_v2 = vld [vmem:[#allocation8 + $0x4a8] ss:$28 sps:$4 sm:$0xff]   ;;  %v2597_v3 = vld [vmem:[#allocation8 + $0xf4] ss:$28 sps:$4 sm:$0xff]  }
 0x12a   :  { %1778 = vmatpush1.bf16.msra.mxu0 %v2511_v4  ;;  %v2600_v4 = vld [vmem:[#allocation8 + $0x474] ss:$28 sps:$4 sm:$0xff]  }
 0x12b   :  { %1819 = vmatpush1.bf16.msra.mxu1 %v2514_v5  ;;  %1779 = vmatprep.subr.bf16.mxu0 %v2519_v6  ;;  %v2595_v5 = vld [vmem:[#allocation8 + $0xf0] ss:$28 sps:$4 sm:$0xff]  }
 0x12c   :  { %1820 = vmatprep.subr.bf16.mxu1 %v2522_v7  ;;  %v2598_v6 = vld [vmem:[#allocation8 + $0x470] ss:$28 sps:$4 sm:$0xff]   ;;  %v2603_v7 = vld [vmem:[#allocation8 + $0xbc] ss:$28 sps:$4 sm:$0xff]  }
 0x12e   :  { %1780 = vmatpush1.bf16.msra.mxu0 %v2517_v8  ;;  %v2606_v8 = vld [vmem:[#allocation8 + $0x43c] ss:$28 sps:$4 sm:$0xff]  }
 0x12f   :  { %1821 = vmatpush1.bf16.msra.mxu1 %v2520_v9  ;;  %1781 = vmatprep.subr.bf16.mxu0 %v2525_v10  ;;  %v2601_v9 = vld [vmem:[#allocation8 + $0xb8] ss:$28 sps:$4 sm:$0xff]  }
 0x130   :  { %1822 = vmatprep.subr.bf16.mxu1 %v2528_v11  ;;  %v2604_v10 = vld [vmem:[#allocation8 + $0x438] ss:$28 sps:$4 sm:$0xff]   ;;  %v2609_v11 = vld [vmem:[#allocation8 + $0x84] ss:$28 sps:$4 sm:$0xff]  }
 0x132   :  { %1782 = vmatpush1.bf16.msra.mxu0 %v2523_v12  ;;  %v2612_v12 = vld [vmem:[#allocation8 + $0x404] ss:$28 sps:$4 sm:$0xff]  }
 0x133   :  { %1823 = vmatpush1.bf16.msra.mxu1 %v2526_v13  ;;  %1783 = vmatprep.subr.bf16.mxu0 %v2531_v14  ;;  %v2607_v13 = vld [vmem:[#allocation8 + $0x80] ss:$28 sps:$4 sm:$0xff]  }
 0x134   :  { %1824 = vmatprep.subr.bf16.mxu1 %v2534_v15  ;;  %v2610_v14 = vld [vmem:[#allocation8 + $0x400] ss:$28 sps:$4 sm:$0xff]   ;;  %v2615_v15 = vld [vmem:[#allocation8 + $0x4c] ss:$28 sps:$4 sm:$0xff]  }
 0x136   :  { %1784 = vmatpush2.bf16.msra.mxu0 %v2529_v16  ;;  %v2618_v16 = vld [vmem:[#allocation8 + $0x3cc] ss:$28 sps:$4 sm:$0xff]  }
 0x137   :  { %1825 = vmatpush2.bf16.msra.mxu1 %v2532_v17  ;;  %1785 = vmatprep.subr.bf16.mxu0 %v2537_v21  ;;  %v2613_v17 = vld [vmem:[#allocation8 + $0x48] ss:$28 sps:$4 sm:$0xff]  }
 0x138   :  { %1826 = vmatprep.subr.bf16.mxu1 %v2540_v24  ;;  %v2616_v21 = vld [vmem:[#allocation8 + $0x3c8] ss:$28 sps:$4 sm:$0xff]   ;;  %v2621_v24 = vld [vmem:[#allocation8 + $0x14] ss:$28 sps:$4 sm:$0xff]  }
 0x13a   :  { %1786 = vmatpush2.bf16.msra.mxu0 %v2535_v25  ;;  %v2624_v25 = vld [vmem:[#allocation8 + $0x394] ss:$28 sps:$4 sm:$0xff]  }
 0x13b   :  { %1827 = vmatpush2.bf16.msra.mxu1 %v2538_v26  ;;  %1787 = vmatprep.subr.bf16.mxu0 %v2543_v27  ;;  %v2619_v26 = vld [vmem:[#allocation8 + $0x10] ss:$28 sps:$4 sm:$0xff]  }
 0x13c   :  { %1828 = vmatprep.subr.bf16.mxu1 %v2546_v28  ;;  %v2622_v27 = vld [vmem:[#allocation8 + $0x390] ss:$28 sps:$4 sm:$0xff]   ;;  %v2627_v28 = vld [vmem:[#allocation8 + $0x35c] ss:$28 sps:$4 sm:$0xff]  }
 0x13e   :  { %1788 = vmatpush2.bf16.msra.mxu0 %v2541_v29  ;;  %v2630_v29 = vld [vmem:[#allocation8 + $0x6dc] ss:$28 sps:$4 sm:$0xff]  }
 0x13f   :  { %1829 = vmatpush2.bf16.msra.mxu1 %v2544_v30  ;;  %1789 = vmatprep.subr.bf16.mxu0 %v2549_v31  ;;  %v2625_v30 = vld [vmem:[#allocation8 + $0x358] ss:$28 sps:$4 sm:$0xff]  }
 0x140   :  { %1830 = vmatprep.subr.bf16.mxu1 %v2552_v32  ;;  %v2628_v31 = vld [vmem:[#allocation8 + $0x6d8] ss:$28 sps:$4 sm:$0xff]   ;;  %v2633_v32 = vld [vmem:[#allocation8 + $0x324] ss:$28 sps:$4 sm:$0xff]  }
 0x142   :  { %1790 = vmatpush2.bf16.msra.mxu0 %v2547_v33  ;;  %v2636_v33 = vld [vmem:[#allocation8 + $0x6a4] ss:$28 sps:$4 sm:$0xff]  }
 0x143   :  { %1831 = vmatpush2.bf16.msra.mxu1 %v2550_v34  ;;  %1791 = vmatprep.subr.bf16.mxu0 %v2555_v35  ;;  %v2631_v34 = vld [vmem:[#allocation8 + $0x320] ss:$28 sps:$4 sm:$0xff]  }
 0x144   :  { %1832 = vmatprep.subr.bf16.mxu1 %v2558_v36  ;;  %v2634_v35 = vld [vmem:[#allocation8 + $0x6a0] ss:$28 sps:$4 sm:$0xff]   ;;  %v2639_v36 = vld [vmem:[#allocation8 + $0x2ec] ss:$28 sps:$4 sm:$0xff]  }
 0x146   :  { %1792 = vmatpush2.bf16.msra.mxu0 %v2553_v37  ;;  %v2642_v37 = vld [vmem:[#allocation8 + $0x66c] ss:$28 sps:$4 sm:$0xff]  }
 0x147   :  { %1833 = vmatpush2.bf16.msra.mxu1 %v2556_v38  ;;  %1793 = vmatprep.subr.bf16.mxu0 %v2561_v39  ;;  %v2637_v38 = vld [vmem:[#allocation8 + $0x2e8] ss:$28 sps:$4 sm:$0xff]  }
 0x148   :  { %1834 = vmatprep.subr.bf16.mxu1 %v2564_v40  ;;  %v2640_v39 = vld [vmem:[#allocation8 + $0x668] ss:$28 sps:$4 sm:$0xff]   ;;  %v2645_v40 = vld [vmem:[#allocation8 + $0x2b4] ss:$28 sps:$4 sm:$0xff]  }
 0x14a   :  { %1794 = vmatpush2.bf16.msra.mxu0 %v2559_v41  ;;  %v2648_v41 = vld [vmem:[#allocation8 + $0x634] ss:$28 sps:$4 sm:$0xff]  }
 0x14b   :  { %1835 = vmatpush2.bf16.msra.mxu1 %v2562_v42  ;;  %1795 = vmatprep.subr.bf16.mxu0 %v2567_v43  ;;  %v2643_v42 = vld [vmem:[#allocation8 + $0x2b0] ss:$28 sps:$4 sm:$0xff]  }
 0x14c   :  { %1836 = vmatprep.subr.bf16.mxu1 %v2570_v46  ;;  %v2646_v43 = vld [vmem:[#allocation8 + $0x630] ss:$28 sps:$4 sm:$0xff]   ;;  %v2651_v46 = vld [vmem:[#allocation8 + $0x27c] ss:$28 sps:$4 sm:$0xff]  }
 0x14e   :  { %1796 = vmatpush2.bf16.msra.mxu0 %v2565_v49  ;;  %v2654_v49 = vld [vmem:[#allocation8 + $0x5fc] ss:$28 sps:$4 sm:$0xff]  }
 0x14f   :  { %1837 = vmatpush2.bf16.msra.mxu1 %v2568_v50  ;;  %1797 = vmatprep.subr.bf16.mxu0 %v2573_v51  ;;  %v2649_v50 = vld [vmem:[#allocation8 + $0x278] ss:$28 sps:$4 sm:$0xff]  }
 0x150   :  { %1838 = vmatprep.subr.bf16.mxu1 %v2576_v52  ;;  %v2652_v51 = vld [vmem:[#allocation8 + $0x5f8] ss:$28 sps:$4 sm:$0xff]   ;;  %v2657_v52 = vld [vmem:[#allocation8 + $0x244] ss:$28 sps:$4 sm:$0xff]  }
 0x152   :  { %1798 = vmatpush2.bf16.msra.mxu0 %v2571_v53  ;;  %v2660_v53 = vld [vmem:[#allocation8 + $0x5c4] ss:$28 sps:$4 sm:$0xff]  }
 0x153   :  { %1839 = vmatpush2.bf16.msra.mxu1 %v2574_v54  ;;  %1849 = vmatprep.subr.bf16.mxu0 %v2579_v55  ;;  %v2655_v54 = vld [vmem:[#allocation8 + $0x240] ss:$28 sps:$4 sm:$0xff]  }
 0x154   :  { %1890 = vmatprep.subr.bf16.mxu1 %v2582_v56  ;;  %v2658_v55 = vld [vmem:[#allocation8 + $0x5c0] ss:$28 sps:$4 sm:$0xff]   ;;  %v2663_v56 = vld [vmem:[#allocation8 + $0x20c] ss:$28 sps:$4 sm:$0xff]  }
 0x155   :  { %1800 = vmatmul.mubr.bf16.vlgmr.msra.gmra.mxu0 %v2919_v47 }
 0x156   :  { %1841 = vmatmul.mubr.bf16.vlgmr.msra.gmra.mxu1 %v2915_v44  ;;  %1850 = vmatpush1.bf16.msra.mxu0 %v2577_v57  ;;  %v2666_v57 = vld [vmem:[#allocation8 + $0x58c] ss:$28 sps:$4 sm:$0xff]  }
 0x157   :  { %1881 = vmatprep.mubr.bf16.mxu0 %v2917_v45  ;;  %1891 = vmatpush1.bf16.msra.mxu1 %v2580_v58  ;;  %v2661_v58 = vld [vmem:[#allocation8 + $0x208] ss:$28 sps:$4 sm:$0xff]  }
 0x158   :  { %1922 = vmatprep.mubr.bf16.mxu1 %v2921_v48  ;;  %1851 = vmatprep.subr.bf16.mxu0 %v2585_v59  ;;  %v2664_v59 = vld [vmem:[#allocation8 + $0x588] ss:$28 sps:$4 sm:$0xff]  }
 0x159   :  { %1892 = vmatprep.subr.bf16.mxu1 %v2588_v60  ;;  %v2669_v60 = vld [vmem:[#allocation8 + $0x1d4] ss:$28 sps:$4 sm:$0xff]  }
 0x15a   :  { %1852 = vmatpush1.bf16.msra.mxu0 %v2583_v61  ;;  %v2672_v61 = vld [vmem:[#allocation8 + $0x554] ss:$28 sps:$4 sm:$0xff]  }
 0x15b   :  { %1893 = vmatpush1.bf16.msra.mxu1 %v2586_v62  ;;  %1853 = vmatprep.subr.bf16.mxu0 %v2591_v63  ;;  %v2667_v62 = vld [vmem:[#allocation8 + $0x1d0] ss:$28 sps:$4 sm:$0xff]  }
 0x15c   :  { %1894 = vmatprep.subr.bf16.mxu1 %v2594_v0  ;;  %v2670_v63 = vld [vmem:[#allocation8 + $0x550] ss:$28 sps:$4 sm:$0xff]   ;;  %v2673_v0 = vld [vmem:[#allocation8 + $0x360] ss:$28 sps:$4 sm:$0xff]  }
 0x15e   :  { %1854 = vmatpush1.bf16.msra.mxu0 %v2589_v1  ;;  %v2674_v1 = vld [vmem:[#allocation8 + $0x6e0] ss:$28 sps:$4 sm:$0xff]  }
 0x15f   :  { %1895 = vmatpush1.bf16.msra.mxu1 %v2592_v2  ;;  %1855 = vmatprep.subr.bf16.mxu0 %v2597_v3  ;;  %v2675_v2 = vld [vmem:[#allocation8 + $0x1a0] ss:$28 sps:$4 sm:$0xff]  }
 0x160   :  { %1896 = vmatprep.subr.bf16.mxu1 %v2600_v4  ;;  %v2676_v3 = vld [vmem:[#allocation8 + $0x520] ss:$28 sps:$4 sm:$0xff]   ;;  %v2677_v4 = vld [vmem:[#allocation8 + $0x328] ss:$28 sps:$4 sm:$0xff]  }
 0x162   :  { %1856 = vmatpush1.bf16.msra.mxu0 %v2595_v5  ;;  %v2678_v5 = vld [vmem:[#allocation8 + $0x6a8] ss:$28 sps:$4 sm:$0xff]  }
 0x163   :  { %1897 = vmatpush1.bf16.msra.mxu1 %v2598_v6  ;;  %1857 = vmatprep.subr.bf16.mxu0 %v2603_v7  ;;  %v2679_v6 = vld [vmem:[#allocation8 + $0x168] ss:$28 sps:$4 sm:$0xff]  }
 0x164   :  { %1898 = vmatprep.subr.bf16.mxu1 %v2606_v8  ;;  %v2680_v7 = vld [vmem:[#allocation8 + $0x4e8] ss:$28 sps:$4 sm:$0xff]   ;;  %v2681_v8 = vld [vmem:[#allocation8 + $0x2f0] ss:$28 sps:$4 sm:$0xff]  }
 0x166   :  { %1858 = vmatpush1.bf16.msra.mxu0 %v2601_v9  ;;  %v2682_v9 = vld [vmem:[#allocation8 + $0x670] ss:$28 sps:$4 sm:$0xff]  }
 0x167   :  { %1899 = vmatpush1.bf16.msra.mxu1 %v2604_v10  ;;  %1859 = vmatprep.subr.bf16.mxu0 %v2609_v11  ;;  %v2683_v10 = vld [vmem:[#allocation8 + $0x130] ss:$28 sps:$4 sm:$0xff]  }
 0x168   :  { %1900 = vmatprep.subr.bf16.mxu1 %v2612_v12  ;;  %v2684_v11 = vld [vmem:[#allocation8 + $0x4b0] ss:$28 sps:$4 sm:$0xff]   ;;  %v2685_v12 = vld [vmem:[#allocation8 + $0x2b8] ss:$28 sps:$4 sm:$0xff]  }
 0x16a   :  { %1860 = vmatpush1.bf16.msra.mxu0 %v2607_v13  ;;  %v2686_v13 = vld [vmem:[#allocation8 + $0x638] ss:$28 sps:$4 sm:$0xff]  }
 0x16b   :  { %1901 = vmatpush1.bf16.msra.mxu1 %v2610_v14  ;;  %1861 = vmatprep.subr.bf16.mxu0 %v2615_v15  ;;  %v2687_v14 = vld [vmem:[#allocation8 + $0xf8] ss:$28 sps:$4 sm:$0xff]   ;;  %v2689_v15 = vld [vmem:[#allocation8 + $0x280] ss:$28 sps:$4 sm:$0xff]  }
 0x16c   :  { %1902 = vmatprep.subr.bf16.mxu1 %v2618_v16  ;;  %v2690_v16 = vld [vmem:[#allocation8 + $0x600] ss:$28 sps:$4 sm:$0xff]  }
 0x16e   :  { %1862 = vmatpush1.bf16.msra.mxu0 %v2613_v17  ;;  %v2692_v17 = vld [vmem:[#allocation8 + $0x440] ss:$28 sps:$4 sm:$0xff]  }
 0x16f   :  { %1903 = vmatpush1.bf16.msra.mxu1 %v2616_v21  ;;  %1863 = vmatprep.subr.bf16.mxu0 %v2621_v24  ;;  %v2693_v21 = vld [vmem:[#allocation8 + $0x248] ss:$28 sps:$4 sm:$0xff]  }
 0x170   :  { %1904 = vmatprep.subr.bf16.mxu1 %v2624_v25  ;;  %v2694_v24 = vld [vmem:[#allocation8 + $0x5c8] ss:$28 sps:$4 sm:$0xff]  }
 0x171   :  { %v2695_v25 = vld [vmem:[#allocation8 + $0x88] ss:$28 sps:$4 sm:$0xff]  }
 0x172   :  { %1864 = vmatpush1.bf16.msra.mxu0 %v2619_v26  ;;  %v2696_v26 = vld [vmem:[#allocation8 + $0x408] ss:$28 sps:$4 sm:$0xff]  }
 0x173   :  { %1905 = vmatpush1.bf16.msra.mxu1 %v2622_v27  ;;  %1865 = vmatprep.subr.bf16.mxu0 %v2627_v28  ;;  %v2697_v27 = vld [vmem:[#allocation8 + $0x210] ss:$28 sps:$4 sm:$0xff]  }
 0x174   :  { %1906 = vmatprep.subr.bf16.mxu1 %v2630_v29  ;;  %v2698_v28 = vld [vmem:[#allocation8 + $0x590] ss:$28 sps:$4 sm:$0xff]  }
 0x175   :  { %v2699_v29 = vld [vmem:[#allocation8 + $0x50] ss:$28 sps:$4 sm:$0xff]  }
 0x176   :  { %1866 = vmatpush2.bf16.msra.mxu0 %v2625_v30  ;;  %v2700_v30 = vld [vmem:[#allocation8 + $0x3d0] ss:$28 sps:$4 sm:$0xff]  }
 0x177   :  { %1907 = vmatpush2.bf16.msra.mxu1 %v2628_v31  ;;  %1867 = vmatprep.subr.bf16.mxu0 %v2633_v32  ;;  %v2701_v31 = vld [vmem:[#allocation8 + $0x1d8] ss:$28 sps:$4 sm:$0xff]  }
 0x178   :  { %1908 = vmatprep.subr.bf16.mxu1 %v2636_v33  ;;  %v2702_v32 = vld [vmem:[#allocation8 + $0x558] ss:$28 sps:$4 sm:$0xff]  }
 0x179   :  { %v2703_v33 = vld [vmem:[#allocation8 + $0x18] ss:$28 sps:$4 sm:$0xff]  }
 0x17a   :  { %1868 = vmatpush2.bf16.msra.mxu0 %v2631_v34  ;;  %v2704_v34 = vld [vmem:[#allocation8 + $0x398] ss:$28 sps:$4 sm:$0xff]  }
 0x17b   :  { %1909 = vmatpush2.bf16.msra.mxu1 %v2634_v35  ;;  %1869 = vmatprep.subr.bf16.mxu0 %v2639_v36  ;;  %v2942_v35 = vld [vmem:[%s2969_s4] sm:$0xff]  ;;  %s2858_s4 = smov [#allocation10]  }
 0x17c   :  { %1910 = vmatprep.subr.bf16.mxu1 %v2642_v37  ;;  %v501_v36 = vrot.slane %v2942_v35, %v85_v19  ;;  %v505_v37 = vrot.slane %v2942_v35, %v89_v22  ;;  %s2067_s15 = sshll.u32 %s2858_s4, 4  ;;  %s2068_s15 = int_to_ptr.vmem [resolvable:$true] %s2067_s15 }
 0x17d   :  { %s2821_s16 = scalar_lea.vmem %s2068_s15, 896  ;;  %p2826_p7 = scmp.lt.s32.totalorder %s2068_s15, %s2068_s15 }
 0x17e   :  { %1870 = vmatpush2.bf16.msra.mxu0 %v2637_v38  ;;  %p2822_p6 = scmp.ne.s32.totalorder %s2068_s15, %s2821_s16  ;;  %p2827_p8 = scmp.lt.s32.totalorder %s2821_s16, %s2821_s16 }
 0x17f   :  { %1911 = vmatpush2.bf16.msra.mxu1 %v2640_v39  ;;  %1871 = vmatprep.subr.bf16.mxu0 %v2645_v40 }
 0x180   :  { %1912 = vmatprep.subr.bf16.mxu1 %v2648_v41  ;;  %p2828_p9 = por %p2827_p8, %p2826_p7 }
 0x182   :  { %1872 = vmatpush2.bf16.msra.mxu0 %v2643_v42  ;;  %p2829_p10 = pnand %p2828_p9, %p2822_p6 }
 0x183   :  { %1913 = vmatpush2.bf16.msra.mxu1 %v2646_v43  ;;  %1873 = vmatprep.subr.bf16.mxu0 %v2651_v46 }
 0x184   :  { %1914 = vmatprep.subr.bf16.mxu1 %v2654_v49 }
 0x186   :  { %1874 = vmatpush2.bf16.msra.mxu0 %v2649_v50 }
 0x187   :  { %1915 = vmatpush2.bf16.msra.mxu1 %v2652_v51  ;;  %1875 = vmatprep.subr.bf16.mxu0 %v2657_v52 }
 0x188   :  { %1916 = vmatprep.subr.bf16.mxu1 %v2660_v53 }
 0x18a   :  { %1876 = vmatpush2.bf16.msra.mxu0 %v2655_v54 }
 0x18b   :  { %1917 = vmatpush2.bf16.msra.mxu1 %v2658_v55  ;;  %1877 = vmatprep.subr.bf16.mxu0 %v2663_v56 }
 0x18c   :  { %1918 = vmatprep.subr.bf16.mxu1 %v2666_v57 }
 0x18e   :  { %1878 = vmatpush2.bf16.msra.mxu0 %v2661_v58  ;;  %v509_v58 = vrot.slane %v2942_v35, %v93_v20 }
 0x18f   :  { %1919 = vmatpush2.bf16.msra.mxu1 %v2664_v59  ;;  %1879 = vmatprep.subr.bf16.mxu0 %v2669_v60  ;;  %v513_v59 = vrot.slane %v2942_v35, %v97_v23 }
 0x190   :  { %1920 = vmatprep.subr.bf16.mxu1 %v2672_v61 }
 0x192   :  { %1880 = vmatpush2.bf16.msra.mxu0 %v2667_v62 }
 0x193   :  { %1921 = vmatpush2.bf16.msra.mxu1 %v2670_v63  ;;  %2321 = vmatprep.subr.bf16.mxu0 %v2673_v0 }
 0x194   :  { %2343 = vmatprep.subr.bf16.mxu1 %v2674_v1 }
 0x195   :  { %1882 = vmatmul.mubr.bf16.vlgmr.msra.gmra.mxu0 %v2919_v47 }
 0x196   :  { %1923 = vmatmul.mubr.bf16.vlgmr.msra.gmra.mxu1 %v2915_v44  ;;  %2322 = vmatpush3.bf16.msra.mxu0 %v2675_v2 }
 0x197   :  { %1963 = vmatprep.mubr.bf16.mxu0 %v2917_v45  ;;  %2344 = vmatpush3.bf16.msra.mxu1 %v2676_v3  ;;  %v2688_v45 = vld [vmem:[#allocation8 + $0x478] ss:$28 sps:$4 sm:$0xff]  }
 0x198   :  { %2003 = vmatprep.mubr.bf16.mxu1 %v2921_v48  ;;  %2323 = vmatprep.subr.bf16.mxu0 %v2677_v4  ;;  %v2691_v48 = vld [vmem:[#allocation8 + $0xc0] ss:$28 sps:$4 sm:$0xff]  }
 0x199   :  { %2345 = vmatprep.subr.bf16.mxu1 %v2678_v5 }
 0x19a   :  { %2324 = vmatpush3.bf16.msra.mxu0 %v2679_v6 }
 0x19b   :  { %2346 = vmatpush3.bf16.msra.mxu1 %v2680_v7  ;;  %2325 = vmatprep.subr.bf16.mxu0 %v2681_v8 }
 0x19c   :  { %2347 = vmatprep.subr.bf16.mxu1 %v2682_v9 }
 0x19e   :  { %2326 = vmatpush3.bf16.msra.mxu0 %v2683_v10 }
 0x19f   :  { %2348 = vmatpush3.bf16.msra.mxu1 %v2684_v11  ;;  %2327 = vmatprep.subr.bf16.mxu0 %v2685_v12 }
 0x1a0   :  { %2349 = vmatprep.subr.bf16.mxu1 %v2686_v13 }
 0x1a2   :  { %2328 = vmatpush3.bf16.msra.mxu0 %v2687_v14  ;;  %v516_v14 = vsub.s32 4, %v2901_v18 }
 0x1a3   :  { %2350 = vmatpush3.bf16.msra.mxu1 %v2688_v45  ;;  %2329 = vmatprep.subr.bf16.mxu0 %v2689_v15  ;;  %v520_v45 = vsub.s32 5, %v2901_v18 }
 0x1a4   :  { %2351 = vmatprep.subr.bf16.mxu1 %v2690_v16  ;;  %v517_v15 = vrot.slane %v2942_v35, %v516_v14 }
 0x1a5   :  { %v521_v16 = vrot.slane %v2942_v35, %v520_v45 }
 0x1a6   :  { %2330 = vmatpush3.bf16.msra.mxu0 %v2691_v48 }
 0x1a7   :  { %2352 = vmatpush3.bf16.msra.mxu1 %v2692_v17  ;;  %2331 = vmatprep.subr.bf16.mxu0 %v2693_v21 }
 0x1a8   :  { %2353 = vmatprep.subr.bf16.mxu1 %v2694_v24 }
 0x1aa   :  { %2332 = vmatpush3.bf16.msra.mxu0 %v2695_v25 }
 0x1ab   :  { %2354 = vmatpush3.bf16.msra.mxu1 %v2696_v26  ;;  %2333 = vmatprep.subr.bf16.mxu0 %v2697_v27 }
 0x1ac   :  { %2355 = vmatprep.subr.bf16.mxu1 %v2698_v28 }
 0x1ae   :  { %2334 = vmatpush3.bf16.msra.mxu0 %v2699_v29 }
 0x1af   :  { %2356 = vmatpush3.bf16.msra.mxu1 %v2700_v30  ;;  %2335 = vmatprep.subr.bf16.mxu0 %v2701_v31 }
 0x1b0   :  { %2357 = vmatprep.subr.bf16.mxu1 %v2702_v32 }
 0x1b2   :  { %2336 = vmatpush3.bf16.msra.mxu0 %v2703_v33 }
 0x1b3   :  { %2358 = vmatpush3.bf16.msra.mxu1 %v2704_v34 }
 0x1b5   :  { %1964 = vmatmul.mubr.bf16.vlgmr.msra.gmra.mxu0 %v2919_v47 }
 0x1b6   :  { %2004 = vmatmul.mubr.bf16.vlgmr.msra.gmra.mxu1 %v2915_v44 }
 0x1d5   :  { %v1719_v38 = vpop.f32.mrf.mxu0 }
 0x1d6   :  { %v1720_v39 = vadd.f32 %v1719_v38, %v501_v36  ;;  %v1760_v40 = vpop.f32.mrf.mxu1 }
 0x1d7   :  { %v1721_v41 = vpop.f32.mrf.mxu0 }
 0x1d8   :  { %v1761_v47 = vadd.f32 %v1760_v40, %v1720_v39  ;;  %v1722_v42 = vadd.f32 %v1721_v41, %v505_v37  ;;  %v1762_v44 = vpop.f32.mrf.mxu1  ;;  %v524_v40 = vsub.s32 6, %v2901_v18 }
 0x1d9   :  { %v1723_v43 = vpop.f32.mrf.mxu0 }
 0x1da   :  { %v2314_v46 = vmul.f32 -1.442695, %v1761_v47  ;;  %v1763_v49 = vadd.f32 %v1762_v44, %v1722_v42  ;;  %v1764_v50 = vpop.f32.mrf.mxu1  ;;  %v525_v42 = vrot.slane %v2942_v35, %v524_v40 }
 0x1db   :  { %v1724_v51 = vpop.f32.mrf.mxu0 }
 0x1dc   :  { %2713 = vpow2.f32 %v2314_v46  ;;  %v2315_v52 = vmul.f32 -1.442695, %v1763_v49  ;;  %v1765_v53 = vpop.f32.mrf.mxu1 }
 0x1de   :  { %2715 = vpow2.f32 %v2315_v52 }
 0x1e9   :  { %v2714_v19 = vpop.eup %2713 }
 0x1ea   :  { %v2032_v54 = vadd.f32 1.0, %v2714_v19 }
 0x1eb   :  { %v2716_v55 = vpop.eup %2715 }
 0x1ec   :  { %2717 = vrcp.f32 %v2032_v54  ;;  %v2033_v22 = vadd.f32 1.0, %v2716_v55 }
 0x1ee   :  { %2719 = vrcp.f32 %v2033_v22 }
 0x1f9   :  { %v2718_v56 = vpop.eup %2717 }
 0x1fa   :  { %2053 = vst [vmem:[#allocation10] sm:$0xff] %v2718_v56 }
 0x1fb   :  { %v2720_v57 = vpop.eup %2719 }
 0x1fc   :  { %2054 = vst [vmem:[#allocation10 + $0x8] sm:$0xff] %v2720_v57 }
 0x215   :  { %v1801_v60 = vpop.f32.mrf.mxu0 }
 0x216   :  { %v1802_v61 = vadd.f32 %v1801_v60, %v509_v58  ;;  %v1842_v62 = vpop.f32.mrf.mxu1 }
 0x217   :  { %v1803_v63 = vpop.f32.mrf.mxu0 }
 0x218   :  { %v1843_v0 = vadd.f32 %v1842_v62, %v1802_v61  ;;  %v1804_v1 = vadd.f32 %v1803_v63, %v513_v59  ;;  %v1844_v2 = vpop.f32.mrf.mxu1 }
 0x219   :  { %v1805_v3 = vpop.f32.mrf.mxu0 }
 0x21a   :  { %v2316_v4 = vmul.f32 -1.442695, %v1843_v0  ;;  %v1845_v5 = vadd.f32 %v1844_v2, %v1804_v1  ;;  %v1846_v6 = vpop.f32.mrf.mxu1 }
 0x21b   :  { %v1806_v7 = vpop.f32.mrf.mxu0 }
 0x21c   :  { %2721 = vpow2.f32 %v2316_v4  ;;  %v2317_v8 = vmul.f32 -1.442695, %v1845_v5  ;;  %v1847_v9 = vpop.f32.mrf.mxu1 }
 0x21e   :  { %2723 = vpow2.f32 %v2317_v8 }
 0x229   :  { %v2722_v20 = vpop.eup %2721 }
 0x22a   :  { %v2034_v10 = vadd.f32 1.0, %v2722_v20 }
 0x22b   :  { %v2724_v11 = vpop.eup %2723 }
 0x22c   :  { %2725 = vrcp.f32 %v2034_v10  ;;  %v2035_v23 = vadd.f32 1.0, %v2724_v11 }
 0x22e   :  { %2727 = vrcp.f32 %v2035_v23 }
 0x239   :  { %v2726_v12 = vpop.eup %2725 }
 0x23a   :  { %2055 = vst [vmem:[#allocation10 + $0x10] sm:$0xff] %v2726_v12 }
 0x23b   :  { %v2728_v13 = vpop.eup %2727 }
 0x23c   :  { %2056 = vst [vmem:[#allocation10 + $0x18] sm:$0xff] %v2728_v13 }
 0x255   :  { %v1883_v48 = vpop.f32.mrf.mxu0 }
 0x256   :  { %v1884_v17 = vadd.f32 %v1883_v48, %v517_v15  ;;  %v1924_v21 = vpop.f32.mrf.mxu1 }
 0x257   :  { %v1885_v24 = vpop.f32.mrf.mxu0 }
 0x258   :  { %v1925_v25 = vadd.f32 %v1924_v21, %v1884_v17  ;;  %v1886_v26 = vadd.f32 %v1885_v24, %v521_v16  ;;  %v1926_v27 = vpop.f32.mrf.mxu1 }
 0x259   :  { %v1887_v28 = vpop.f32.mrf.mxu0 }
 0x25a   :  { %v2318_v29 = vmul.f32 -1.442695, %v1925_v25  ;;  %v1927_v30 = vadd.f32 %v1926_v27, %v1886_v26  ;;  %v1928_v31 = vpop.f32.mrf.mxu1 }
 0x25b   :  { %v1888_v32 = vpop.f32.mrf.mxu0 }
 0x25c   :  { %2729 = vpow2.f32 %v2318_v29  ;;  %v2319_v33 = vmul.f32 -1.442695, %v1927_v30  ;;  %v1929_v34 = vpop.f32.mrf.mxu1 }
 0x25e   :  { %2731 = vpow2.f32 %v2319_v33 }
 0x269   :  { %v2730_v36 = vpop.eup %2729 }
 0x26a   :  { %v2036_v37 = vadd.f32 1.0, %v2730_v36 }
 0x26b   :  { %v2732_v38 = vpop.eup %2731 }
 0x26c   :  { %2733 = vrcp.f32 %v2036_v37  ;;  %v2037_v39 = vadd.f32 1.0, %v2732_v38 }
 0x26e   :  { %2735 = vrcp.f32 %v2037_v39 }
 0x275   :  { %v2337_v41 = vpop.f32.mrf.mxu0 }
 0x276   :  { %v2359_v47 = vpop.f32.mrf.mxu1 }
 0x277   :  { %v2338_v44 = vpop.f32.mrf.mxu0 }
 0x278   :  { %v2339_v43 = vadd.f32 %v2338_v44, %v2337_v41  ;;  %v2360_v46 = vpop.f32.mrf.mxu1 }
 0x279   :  { %v2734_v49 = vpop.eup %2733  ;;  %v2340_v50 = vpop.f32.mrf.mxu0  ;;  %v2361_v52 = vadd.f32 %v2360_v46, %v2359_v47 }
 0x27a   :  { %2057 = vst [vmem:[#allocation10 + $0x20] sm:$0xff] %v2734_v49  ;;  %v1966_v51 = vadd.f32 %v2339_v43, %v525_v42  ;;  %v2362_v53 = vpop.f32.mrf.mxu1 }
 0x27b   :  { %v2736_v19 = vpop.eup %2735  ;;  %v2341_v54 = vpop.f32.mrf.mxu0 }
 0x27c   :  { %2058 = vst [vmem:[#allocation10 + $0x28] sm:$0xff] %v2736_v19  ;;  %v2006_v55 = vadd.f32 %v2361_v52, %v1966_v51  ;;  %v2363_v22 = vpop.f32.mrf.mxu1 }
 0x27e   :  { %v2320_v56 = vmul.f32 -1.442695, %v2006_v55 }
 0x280   :  { %2737 = vpow2.f32 %v2320_v56 }
 0x28d   :  { %v2738_v18 = vpop.eup %2737 }
 0x28e   :  { %v2038_v57 = vadd.f32 1.0, %v2738_v18 }
 0x290   :  { %2739 = vrcp.f32 %v2038_v57 }
 0x29d   :  { %v2740_v35 = vpop.eup %2739 }
 0x29e   :  { %2060 = vst.msk [vmem:[#allocation10 + $0x30] sm:$0xff] %vm2059_vm2, %v2740_v35 }
 0x29f   :  { %2832 = shalt.err (!%p2829_p10)
}
 0x2a0   :  { %2070 = dma.vmem_to_hbm [thread:$0]  %s2068_s15, 896, %s2970_s5, [#allocation4]  }
 0x2a1   :  { %2847 = dma.done.wait [#allocation4], 896  }
 0x2a2   :  { %2848 = vsyncadd [#allocation4], 4294966400 }
 0x2a3   :  { %2074 = vsyncpa [#allocation3], 1 }
 0x2a4   :  { %2075 = vsyncpa [#allocation6], 1 }
 0x2a5   :  { %2076 = vsyncpa [#allocation9], 1 }
 0x2a6   :  { %2077 = vsyncpa [#allocation4], 1 }

</bundles_post_ra>
